<compile_context>
chip_gen: v7x
topology: tpu7x:2x2x1
jax: 0.10.0
libtpu: 0.0.40
codegen_flags: <defaults>
</compile_context>

<pallas_src>
import functools

import jax
import jax.numpy as jnp
from jax.experimental import pallas as pl
from jax.experimental.pallas import tpu as pltpu


def _round_up(x, m):
    return -(-x // m) * m


def conv2d_fa_forward(x_nchw, weight_oihw, bias, *, stride=(1, 1),
                      padding=(0, 0), dilation=(1, 1), groups=1,
                      compute_dtype=None):
    """Forward pass of Conv2dFA (== F.conv2d) via a Pallas TPU kernel."""
    if groups != 1:
        # TODO(synk): grouped convolution not implemented in the Pallas kernel.
        raise NotImplementedError("groups != 1 not supported")

    n, cin, h, w = x_nchw.shape
    cout, cin_w, kh, kw = weight_oihw.shape
    assert cin_w == cin
    sh, sw = stride
    ph, pw = padding
    dh, dw = dilation

    oh = (h + 2 * ph - dh * (kh - 1) - 1) // sh + 1
    ow = (w + 2 * pw - dw * (kw - 1) - 1) // sw + 1
    hp, wp = h + 2 * ph, w + 2 * pw
    oh_d = hp - dh * (kh - 1)          # dense (stride-1) output rows

    # bf16 compute by default for f32 inputs (MXU-native, half the DMA bytes);
    # accumulation stays f32 below.
    if compute_dtype is not None:
        cdt = compute_dtype
    elif x_nchw.dtype == jnp.float32:
        cdt = jnp.bfloat16
    else:
        cdt = x_nchw.dtype

    # Dense "wide" output: per image, rows = oh_d, width = wp (columns >= the
    # true OW receive garbage from row wrap-around and are cropped after).
    m_valid = oh_d * wp
    m_pad = _round_up(m_valid, 128)                      # lane-dense output
    max_off = (kh - 1) * dh * wp + (kw - 1) * dw          # largest tap shift
    l_pad = _round_up(max(hp * wp, max_off + m_pad), 128)  # no OOB lane reads
    cout_pad = _round_up(cout, 8)                         # sublane granularity

    # ---- wrapper glue: pad + flatten only (no im2col patch matrix) ----------
    x_pad = jnp.pad(x_nchw, ((0, 0), (0, 0), (ph, ph), (pw, pw)))
    x_flat = x_pad.reshape(n, cin, hp * wp).astype(cdt)
    x_flat = jnp.pad(x_flat, ((0, 0), (0, 0), (0, l_pad - hp * wp)))

    # Weights laid out as (KH*KW, Cout_pad, Cin): per-tap (Cout, Cin) slabs.
    w_t = jnp.transpose(weight_oihw, (2, 3, 0, 1)).reshape(kh * kw, cout, cin)
    w_t = jnp.pad(w_t, ((0, 0), (0, cout_pad - cout), (0, 0))).astype(cdt)

    if bias is None:
        b2 = jnp.zeros((cout_pad, 1), jnp.float32)
    else:
        b2 = jnp.pad(bias.astype(jnp.float32),
                     (0, cout_pad - cout)).reshape(cout_pad, 1)

    def kernel(x_ref, w_ref, b_ref, o_ref):
        # x_ref : (1, Cin, l_pad)      flattened padded image (compute dtype)
        # w_ref : (KH*KW, Cout_pad, Cin) resident weights
        # b_ref : (Cout_pad, 1)        f32 bias column
        # o_ref : (1, Cout_pad, m_pad) lane-dense output tile
        acc = jnp.zeros((cout_pad, m_pad), jnp.float32)
        for ikh in range(kh):
            for ikw in range(kw):
                t = ikh * kw + ikw
                off = ikh * dh * wp + ikw * dw            # static shift
                x_win = x_ref[0, :, pl.ds(off, m_pad)]    # (Cin, m_pad)
                acc += jnp.dot(w_ref[t], x_win,
                               preferred_element_type=jnp.float32)
        acc += b_ref[...]                                 # f32 bias, one pass
        o_ref[0] = acc.astype(o_ref.dtype)

    # VMEM budget (double-buffered streaming input/output + resident weights).
    itemsize = jnp.dtype(cdt).itemsize
    x_block_bytes = cin * l_pad * itemsize
    out_block_bytes = cout_pad * m_pad * jnp.dtype(x_nchw.dtype).itemsize
    w_bytes = kh * kw * cout_pad * cin * itemsize
    vmem_need = 2 * (x_block_bytes + out_block_bytes) + w_bytes + cout_pad * 4
    vmem_limit = int(min(max(4 * vmem_need, 32 * 1024 * 1024),
                         48 * 1024 * 1024))               # v7x-safe ceiling

    out3 = pl.pallas_call(
        kernel,
        out_shape=jax.ShapeDtypeStruct((n, cout_pad, m_pad), x_nchw.dtype),
        grid_spec=pltpu.PrefetchScalarGridSpec(
            num_scalar_prefetch=0,
            grid=(n,),                                    # >=2 parallel steps
            in_specs=[
                pl.BlockSpec((1, cin, l_pad), lambda i: (i, 0, 0)),      # x
                pl.BlockSpec((kh * kw, cout_pad, cin), lambda i: (0, 0, 0)),
                pl.BlockSpec((cout_pad, 1), lambda i: (0, 0)),           # bias
            ],
            out_specs=pl.BlockSpec((1, cout_pad, m_pad), lambda i: (i, 0, 0)),
        ),
        compiler_params=pltpu.CompilerParams(
            dimension_semantics=("parallel",),
            vmem_limit_bytes=vmem_limit),
    )(x_flat, w_t, b2)

    # Crop padding lanes / channels, then apply output striding (pure slices,
    # already in NCHW order -> no transpose).
    dense = out3[:, :cout, :m_valid].reshape(n, cout, oh_d, wp)
    out = dense[:, :, :(oh - 1) * sh + 1:sh, :(ow - 1) * sw + 1:sw]
    return out


if __name__ == "__main__":
    # Module config: Conv2dFA(in_channels=4, out_channels=8, kernel_size=3,
    #                         stride=1, padding=1, bias=True)
    in_channels, out_channels, ksize = 4, 8, 3

    key = jax.random.PRNGKey(0)
    kx, kw_, kfa, kb = jax.random.split(key, 4)

    fan_in = in_channels * ksize * ksize
    w_bound = (6.0 / fan_in) ** 0.5
    b_bound = 1.0 / (fan_in ** 0.5)
    weight = jax.random.uniform(kw_, (out_channels, in_channels, ksize, ksize),
                                jnp.float32, -w_bound, w_bound)
    # weight_fa exists in the module but only affects backward; unused in fwd.
    weight_fa = jax.random.uniform(kfa, (out_channels, in_channels, ksize, ksize),
                                   jnp.float32, -w_bound, w_bound)
    bias = jax.random.uniform(kb, (out_channels,), jnp.float32,
                              -b_bound, b_bound)

    x = jax.random.normal(kx, (2, in_channels, 16, 16), jnp.float32)  # NCHW

    def reference(stride, padding, dilation):
        out = jax.lax.conv_general_dilated(
            x, weight, window_strides=stride,
            padding=[(padding[0], padding[0]), (padding[1], padding[1])],
            rhs_dilation=dilation,
            dimension_numbers=("NCHW", "OIHW", "NCHW"))
        return out + bias.reshape(1, out_channels, 1, 1)

    def check(stride, padding, dilation, compute_dtype, atol):
        fwd = jax.jit(functools.partial(
            conv2d_fa_forward, stride=stride, padding=padding,
            dilation=dilation, groups=1, compute_dtype=compute_dtype))
        out = jax.block_until_ready(fwd(x, weight, bias))
        ref = reference(stride, padding, dilation)
        assert out.shape == ref.shape, (out.shape, ref.shape)
        err = float(jnp.max(jnp.abs(out - ref)))
        assert err < atol, (stride, padding, dilation, compute_dtype, err)

    # Module's configured forward (stride=1, padding=1):
    #   exact-math check in f32, plus the default bf16-compute fast path.
    check((1, 1), (1, 1), (1, 1), jnp.float32, 1e-4)
    check((1, 1), (1, 1), (1, 1), None, 5e-2)       # bf16 compute, f32 accum
    # Stride and dilation handling.
    check((2, 2), (1, 1), (1, 1), jnp.float32, 1e-4)
    check((1, 1), (2, 2), (2, 2), jnp.float32, 1e-4)

    print("KERNEL_OK")
</pallas_src>

<mosaic_0001>
module attributes {stable_mosaic.version = 11 : i64} {
  func.func @kernel(%arg0: i32, %arg1: memref<1x4x512xf32, #tpu.memory_space<vmem>>, %arg2: memref<9x8x4xf32, #tpu.memory_space<vmem>>, %arg3: memref<8x1xf32, #tpu.memory_space<vmem>>, %arg4: memref<1x8x384xf32, #tpu.memory_space<vmem>>) attributes {dimension_semantics = [#tpu.dimension_semantics<parallel>], iteration_bounds = array<i64: 2>, scalar_prefetch = 0 : i64, scratch_operands = 0 : i64, tpu.core_type = #tpu.core_type<tc>, window_params = [{transform_indices = @transform_0, window_bounds = array<i64: 1, 4, 512>}, {pipeline_mode = #tpu.pipeline_mode<synchronous>, transform_indices = @transform_1, window_bounds = array<i64: 9, 8, 4>}, {pipeline_mode = #tpu.pipeline_mode<synchronous>, transform_indices = @transform_2, window_bounds = array<i64: 8, 1>}, {transform_indices = @transform_3, window_bounds = array<i64: 1, 8, 384>}]} {
    %cst = arith.constant 0.000000e+00 : f32
    %0 = vector.broadcast %cst : f32 to vector<8x384xf32>
    %c0 = arith.constant 0 : index
    %c0_0 = arith.constant 0 : index
    %c0_1 = arith.constant 0 : index
    %1 = vector.load %arg1[%c0, %c0_0, %c0_1] : memref<1x4x512xf32, #tpu.memory_space<vmem>>, vector<1x4x384xf32>
    %2 = vector.shape_cast %1 : vector<1x4x384xf32> to vector<4x384xf32>
    %c0_2 = arith.constant 0 : index
    %c0_3 = arith.constant 0 : index
    %c0_4 = arith.constant 0 : index
    %3 = vector.load %arg2[%c0_2, %c0_3, %c0_4] : memref<9x8x4xf32, #tpu.memory_space<vmem>>, vector<1x8x4xf32>
    %4 = vector.shape_cast %3 : vector<1x8x4xf32> to vector<8x4xf32>
    %cst_5 = arith.constant dense<0.000000e+00> : vector<8x384xf32>
    %5 = tpu.matmul %4, %2, %cst_5 {dimension_numbers = #tpu.dot_dimension_numbers<[1], [0], [0], [1], [0, 0, 1, 1], [], []>} : vector<8x4xf32>, vector<4x384xf32>, vector<8x384xf32> -> vector<8x384xf32>
    %6 = arith.addf %0, %5 : vector<8x384xf32>
    %c0_6 = arith.constant 0 : index
    %c0_7 = arith.constant 0 : index
    %c1 = arith.constant 1 : index
    %7 = vector.load %arg1[%c0_6, %c0_7, %c1] : memref<1x4x512xf32, #tpu.memory_space<vmem>>, vector<1x4x384xf32>
    %8 = vector.shape_cast %7 : vector<1x4x384xf32> to vector<4x384xf32>
    %c1_8 = arith.constant 1 : index
    %c0_9 = arith.constant 0 : index
    %c0_10 = arith.constant 0 : index
    %9 = vector.load %arg2[%c1_8, %c0_9, %c0_10] : memref<9x8x4xf32, #tpu.memory_space<vmem>>, vector<1x8x4xf32>
    %10 = vector.shape_cast %9 : vector<1x8x4xf32> to vector<8x4xf32>
    %cst_11 = arith.constant dense<0.000000e+00> : vector<8x384xf32>
    %11 = tpu.matmul %10, %8, %cst_11 {dimension_numbers = #tpu.dot_dimension_numbers<[1], [0], [0], [1], [0, 0, 1, 1], [], []>} : vector<8x4xf32>, vector<4x384xf32>, vector<8x384xf32> -> vector<8x384xf32>
    %12 = arith.addf %6, %11 : vector<8x384xf32>
    %c0_12 = arith.constant 0 : index
    %c0_13 = arith.constant 0 : index
    %c2 = arith.constant 2 : index
    %13 = vector.load %arg1[%c0_12, %c0_13, %c2] : memref<1x4x512xf32, #tpu.memory_space<vmem>>, vector<1x4x384xf32>
    %14 = vector.shape_cast %13 : vector<1x4x384xf32> to vector<4x384xf32>
    %c2_14 = arith.constant 2 : index
    %c0_15 = arith.constant 0 : index
    %c0_16 = arith.constant 0 : index
    %15 = vector.load %arg2[%c2_14, %c0_15, %c0_16] : memref<9x8x4xf32, #tpu.memory_space<vmem>>, vector<1x8x4xf32>
    %16 = vector.shape_cast %15 : vector<1x8x4xf32> to vector<8x4xf32>
    %cst_17 = arith.constant dense<0.000000e+00> : vector<8x384xf32>
    %17 = tpu.matmul %16, %14, %cst_17 {dimension_numbers = #tpu.dot_dimension_numbers<[1], [0], [0], [1], [0, 0, 1, 1], [], []>} : vector<8x4xf32>, vector<4x384xf32>, vector<8x384xf32> -> vector<8x384xf32>
    %18 = arith.addf %12, %17 : vector<8x384xf32>
    %c0_18 = arith.constant 0 : index
    %c0_19 = arith.constant 0 : index
    %c18 = arith.constant 18 : index
    %19 = vector.load %arg1[%c0_18, %c0_19, %c18] : memref<1x4x512xf32, #tpu.memory_space<vmem>>, vector<1x4x384xf32>
    %20 = vector.shape_cast %19 : vector<1x4x384xf32> to vector<4x384xf32>
    %c3 = arith.constant 3 : index
    %c0_20 = arith.constant 0 : index
    %c0_21 = arith.constant 0 : index
    %21 = vector.load %arg2[%c3, %c0_20, %c0_21] : memref<9x8x4xf32, #tpu.memory_space<vmem>>, vector<1x8x4xf32>
    %22 = vector.shape_cast %21 : vector<1x8x4xf32> to vector<8x4xf32>
    %cst_22 = arith.constant dense<0.000000e+00> : vector<8x384xf32>
    %23 = tpu.matmul %22, %20, %cst_22 {dimension_numbers = #tpu.dot_dimension_numbers<[1], [0], [0], [1], [0, 0, 1, 1], [], []>} : vector<8x4xf32>, vector<4x384xf32>, vector<8x384xf32> -> vector<8x384xf32>
    %24 = arith.addf %18, %23 : vector<8x384xf32>
    %c0_23 = arith.constant 0 : index
    %c0_24 = arith.constant 0 : index
    %c19 = arith.constant 19 : index
    %25 = vector.load %arg1[%c0_23, %c0_24, %c19] : memref<1x4x512xf32, #tpu.memory_space<vmem>>, vector<1x4x384xf32>
    %26 = vector.shape_cast %25 : vector<1x4x384xf32> to vector<4x384xf32>
    %c4 = arith.constant 4 : index
    %c0_25 = arith.constant 0 : index
    %c0_26 = arith.constant 0 : index
    %27 = vector.load %arg2[%c4, %c0_25, %c0_26] : memref<9x8x4xf32, #tpu.memory_space<vmem>>, vector<1x8x4xf32>
    %28 = vector.shape_cast %27 : vector<1x8x4xf32> to vector<8x4xf32>
    %cst_27 = arith.constant dense<0.000000e+00> : vector<8x384xf32>
    %29 = tpu.matmul %28, %26, %cst_27 {dimension_numbers = #tpu.dot_dimension_numbers<[1], [0], [0], [1], [0, 0, 1, 1], [], []>} : vector<8x4xf32>, vector<4x384xf32>, vector<8x384xf32> -> vector<8x384xf32>
    %30 = arith.addf %24, %29 : vector<8x384xf32>
    %c0_28 = arith.constant 0 : index
    %c0_29 = arith.constant 0 : index
    %c20 = arith.constant 20 : index
    %31 = vector.load %arg1[%c0_28, %c0_29, %c20] : memref<1x4x512xf32, #tpu.memory_space<vmem>>, vector<1x4x384xf32>
    %32 = vector.shape_cast %31 : vector<1x4x384xf32> to vector<4x384xf32>
    %c5 = arith.constant 5 : index
    %c0_30 = arith.constant 0 : index
    %c0_31 = arith.constant 0 : index
    %33 = vector.load %arg2[%c5, %c0_30, %c0_31] : memref<9x8x4xf32, #tpu.memory_space<vmem>>, vector<1x8x4xf32>
    %34 = vector.shape_cast %33 : vector<1x8x4xf32> to vector<8x4xf32>
    %cst_32 = arith.constant dense<0.000000e+00> : vector<8x384xf32>
    %35 = tpu.matmul %34, %32, %cst_32 {dimension_numbers = #tpu.dot_dimension_numbers<[1], [0], [0], [1], [0, 0, 1, 1], [], []>} : vector<8x4xf32>, vector<4x384xf32>, vector<8x384xf32> -> vector<8x384xf32>
    %36 = arith.addf %30, %35 : vector<8x384xf32>
    %c0_33 = arith.constant 0 : index
    %c0_34 = arith.constant 0 : index
    %c36 = arith.constant 36 : index
    %37 = vector.load %arg1[%c0_33, %c0_34, %c36] : memref<1x4x512xf32, #tpu.memory_space<vmem>>, vector<1x4x384xf32>
    %38 = vector.shape_cast %37 : vector<1x4x384xf32> to vector<4x384xf32>
    %c6 = arith.constant 6 : index
    %c0_35 = arith.constant 0 : index
    %c0_36 = arith.constant 0 : index
    %39 = vector.load %arg2[%c6, %c0_35, %c0_36] : memref<9x8x4xf32, #tpu.memory_space<vmem>>, vector<1x8x4xf32>
    %40 = vector.shape_cast %39 : vector<1x8x4xf32> to vector<8x4xf32>
    %cst_37 = arith.constant dense<0.000000e+00> : vector<8x384xf32>
    %41 = tpu.matmul %40, %38, %cst_37 {dimension_numbers = #tpu.dot_dimension_numbers<[1], [0], [0], [1], [0, 0, 1, 1], [], []>} : vector<8x4xf32>, vector<4x384xf32>, vector<8x384xf32> -> vector<8x384xf32>
    %42 = arith.addf %36, %41 : vector<8x384xf32>
    %c0_38 = arith.constant 0 : index
    %c0_39 = arith.constant 0 : index
    %c37 = arith.constant 37 : index
    %43 = vector.load %arg1[%c0_38, %c0_39, %c37] : memref<1x4x512xf32, #tpu.memory_space<vmem>>, vector<1x4x384xf32>
    %44 = vector.shape_cast %43 : vector<1x4x384xf32> to vector<4x384xf32>
    %c7 = arith.constant 7 : index
    %c0_40 = arith.constant 0 : index
    %c0_41 = arith.constant 0 : index
    %45 = vector.load %arg2[%c7, %c0_40, %c0_41] : memref<9x8x4xf32, #tpu.memory_space<vmem>>, vector<1x8x4xf32>
    %46 = vector.shape_cast %45 : vector<1x8x4xf32> to vector<8x4xf32>
    %cst_42 = arith.constant dense<0.000000e+00> : vector<8x384xf32>
    %47 = tpu.matmul %46, %44, %cst_42 {dimension_numbers = #tpu.dot_dimension_numbers<[1], [0], [0], [1], [0, 0, 1, 1], [], []>} : vector<8x4xf32>, vector<4x384xf32>, vector<8x384xf32> -> vector<8x384xf32>
    %48 = arith.addf %42, %47 : vector<8x384xf32>
    %c0_43 = arith.constant 0 : index
    %c0_44 = arith.constant 0 : index
    %c38 = arith.constant 38 : index
    %49 = vector.load %arg1[%c0_43, %c0_44, %c38] : memref<1x4x512xf32, #tpu.memory_space<vmem>>, vector<1x4x384xf32>
    %50 = vector.shape_cast %49 : vector<1x4x384xf32> to vector<4x384xf32>
    %c8 = arith.constant 8 : index
    %c0_45 = arith.constant 0 : index
    %c0_46 = arith.constant 0 : index
    %51 = vector.load %arg2[%c8, %c0_45, %c0_46] : memref<9x8x4xf32, #tpu.memory_space<vmem>>, vector<1x8x4xf32>
    %52 = vector.shape_cast %51 : vector<1x8x4xf32> to vector<8x4xf32>
    %cst_47 = arith.constant dense<0.000000e+00> : vector<8x384xf32>
    %53 = tpu.matmul %52, %50, %cst_47 {dimension_numbers = #tpu.dot_dimension_numbers<[1], [0], [0], [1], [0, 0, 1, 1], [], []>} : vector<8x4xf32>, vector<4x384xf32>, vector<8x384xf32> -> vector<8x384xf32>
    %54 = arith.addf %48, %53 : vector<8x384xf32>
    %c0_48 = arith.constant 0 : index
    %c0_49 = arith.constant 0 : index
    %55 = vector.load %arg3[%c0_48, %c0_49] : memref<8x1xf32, #tpu.memory_space<vmem>>, vector<8x1xf32>
    %56 = vector.broadcast %55 : vector<8x1xf32> to vector<8x384xf32>
    %57 = arith.addf %54, %56 : vector<8x384xf32>
    %c0_50 = arith.constant 0 : index
    %c0_51 = arith.constant 0 : index
    %c0_52 = arith.constant 0 : index
    %58 = vector.load %arg4[%c0_50, %c0_51, %c0_52] : memref<1x8x384xf32, #tpu.memory_space<vmem>>, vector<1x8x384xf32>
    %59 = vector.shape_cast %58 : vector<1x8x384xf32> to vector<8x384xf32>
    %60 = vector.shape_cast %57 : vector<8x384xf32> to vector<1x8x384xf32>
    tpu.vector_store %arg4[%c0_50, %c0_51, %c0_52], %60 {strides = array<i32>} : memref<1x8x384xf32, #tpu.memory_space<vmem>>, vector<1x8x384xf32>,
    return
  }
  func.func @transform_0(%arg0: i32) -> (i32, i32, i32) {
    %c0_i32 = arith.constant 0 : i32
    %c0_i32_0 = arith.constant 0 : i32
    %c0_i32_1 = arith.constant 0 : i32
    return %arg0, %c0_i32, %c0_i32_0 : i32, i32, i32
  }
  func.func @transform_1(%arg0: i32) -> (i32, i32, i32) {
    %c0_i32 = arith.constant 0 : i32
    %c0_i32_0 = arith.constant 0 : i32
    %c0_i32_1 = arith.constant 0 : i32
    %c0_i32_2 = arith.constant 0 : i32
    return %c0_i32, %c0_i32_0, %c0_i32_1 : i32, i32, i32
  }
  func.func @transform_2(%arg0: i32) -> (i32, i32) {
    %c0_i32 = arith.constant 0 : i32
    %c0_i32_0 = arith.constant 0 : i32
    %c0_i32_1 = arith.constant 0 : i32
    return %c0_i32, %c0_i32_0 : i32, i32
  }
  func.func @transform_3(%arg0: i32) -> (i32, i32, i32) {
    %c0_i32 = arith.constant 0 : i32
    %c0_i32_0 = arith.constant 0 : i32
    %c0_i32_1 = arith.constant 0 : i32
    return %arg0, %c0_i32, %c0_i32_0 : i32, i32, i32
  }
}

</mosaic_0001>

<bundles_post_ra>
// kernel: conv2d_fa_forward.1
= control target key start
LH: loop header
LB: loop body
LE: loop exit
PB: predicated region body
PF: predicated region fallthrough
CT: control target
= control target key end

     0   :  { %s1982_s12 = smov 0   ;;  %s2164_s0 = inlined_call_operand.vmem [shape: f32[2,4,512], index: 0, kind: input, shape index: {}]   ;;  %s2165_s1 = inlined_call_operand.vmem [shape: f32[9,8,4], index: 1, kind: input, shape index: {}]   ;;  %s2166_s2 = inlined_call_operand.vmem [shape: f32[8,1], index: 2, kind: input, shape index: {}]   ;;  %s2167_s3 = inlined_call_operand.vmem [shape: f32[2,8,384], index: 3, kind: output, shape index: {}]  }
   0x1 LB: > { %s1777_s13 = sadd.s32 4294967295, %s1949_s12   ;;  %p1781_p0 = scmp.ge.s32.totalorder %s1949_s12, 1  ;;  %s1949_s12 = sphi %s1982_s12, %s13_s12  }
   0x2   : > { %p137_p1 = scmp.lt.s32.totalorder %s1949_s12, 3 }
   0x4   : > { %p138_p2 = pnand %p1781_p0, %p137_p1 }
   0x5   : > { %p161_p3 = scmp.lt.s32.totalorder (!%p138_p2), %s1777_s13, 1  ;;  %v1951_v0 = vmov (!%p138_p2), 0.0   ;;  %s1952_s18 = smov (!%p138_p2), 127   ;;  %vm1954_vm0 = vmmov (!%p138_p2), 0   ;;  %v1961_v5 = vmov (!%p138_p2), 0   ;;  %v1710_v6 = vld [vmem:[%s2166_s2] sm:$0xff] (!%p138_p2) }
   0x6   : > { %141 = sbr.rel (%p138_p2) target bundleno = 421 (0x1a5), region = 32  ;;  %269 = vmatprep.mubr.f32.mxu0 (!%p138_p2), %v1951_v0  ;;  %1859 = vmatprep.subr.mxu1 (!%p138_p2), %v1951_v0  ;;  %s1953_s19 = smov (!%p138_p2), 126   ;;  %vm190_vm1 = vcmask (!%p138_p2), 1039360   ;;  %vm198_vm2 = vcmask (!%p138_p2), 1043456   ;;  %v1785_v12 = vld [vmem:[%s2165_s1 + $0x8] sm:$0xff] (!%p138_p2)  ;;  %vm194_vm3 = vcmask (!%p138_p2), 31744  }
   0x7   : > { %1861 = vmatprep.mubr.msk.f32.mxu1 (!%p138_p2), %vm1954_vm0, %v1951_v0  ;;  %s1955_s20 = smov (!%p138_p2), 110   ;;  %s1956_s21 = smov (!%p138_p2), 109   ;;  %1940 = vset.pattern.permute.xlu0 (!%p138_p2), %v1961_v5  ;;  %vm515_vm4 = vcmask (!%p138_p2), 1031168   ;;  %vm688_vm5 = vcmask (!%p138_p2), 900096   ;;  %v173_v19 = vld [vmem:[%s2165_s1] sm:$0xff] (!%p138_p2)  ;;  %vm861_vm6 = vcmask (!%p138_p2), 891904  }
   0x8   : > { %s1957_s22 = smov (!%p138_p2), 108   ;;  %s1958_s23 = smov (!%p138_p2), 92   ;;  %v1796_v28 = vld [vmem:[%s2165_s1 + $0x10] sm:$0xff] (!%p138_p2)  ;;  %vm1034_vm7 = vcmask (!%p138_p2), 883712   ;;  %v1802_v36 = vld [vmem:[%s2165_s1 + $0x18] sm:$0xff] (!%p138_p2)  ;;  %v1808_v45 = vld [vmem:[%s2165_s1 + $0x20] sm:$0xff] (!%p138_p2) }
   0x9   : > { %s1959_s24 = smov (!%p138_p2), 91   ;;  %s1960_s25 = smov (!%p138_p2), 90   ;;  %vm1207_vm8 = vcmask (!%p138_p2), 752640   ;;  %v1814_v52 = vld [vmem:[%s2165_s1 + $0x28] sm:$0xff] (!%p138_p2)  ;;  %vm1380_vm9 = vcmask (!%p138_p2), 744448   ;;  %v1820_v58 = vld [vmem:[%s2165_s1 + $0x30] sm:$0xff] (!%p138_p2) }
   0xa   : > { %v1826_v63 = vld [vmem:[%s2165_s1 + $0x38] sm:$0xff] (!%p138_p2)  ;;  %vm1553_vm10 = vcmask (!%p138_p2), 736256  }
   0xd   : > { %s2169_s13 = smov (!%p161_p3, %s1777_s13), 1 }
   0xe   : > { %s1840_s14 = sshll.u32 %s2169_s13, 4 }
   0xf   : > { %s1998_s17 = scalar_lea.vmem %s2164_s0, %s1840_s14 }
  0x10   : > { %v2001_v1 = vld [vmem:[%s1998_s17] sm:$0xff]  ;;  %v175_v3 = vld [vmem:[%s1998_s17 + $0x8] sm:$0xff] }
  0x11   : > { %182 = vrot.lane.b32.xlu1 %v2001_v1, %s1952_s18  ;;  %v2006_v2 = vcombine.high %v2001_v1, %v2001_v1  ;;  %v181_v4 = vcombine.high %v175_v3, %v175_v3  ;;  %v172_v25 = vld [vmem:[%s1998_s17 + $0x8] sm:$0xf] }
  0x13   : > { %184 = vrot.lane.b32.xlu0 %v2006_v2, %s1952_s18 }
  0x15   : > { %507 = vrot.lane.b32.xlu1 %v2001_v1, %s1953_s19 }
  0x17   : > { %186 = vrot.lane.b32.xlu0 %v175_v3, %s1952_s18 }
  0x19   : > { %509 = vrot.lane.b32.xlu1 %v2006_v2, %s1953_s19 }
  0x1b   : > { %511 = vrot.lane.b32.xlu0 %v175_v3, %s1953_s19 }
  0x1d   : > { %684 = vrot.lane.b32.xlu1 %v175_v3, %s1955_s20 }
  0x1f   : > { %682 = vrot.lane.b32.xlu0 %v2006_v2, %s1955_s20 }
  0x21   : > { %188 = vrot.lane.b32.xlu1 %v181_v4, %s1952_s18 }
  0x23   : > { %680 = vrot.lane.b32.xlu0 %v2001_v1, %s1955_s20 }
  0x25   : > { %857 = vrot.lane.b32.xlu1 %v175_v3, %s1956_s21 }
  0x27   : > { %855 = vrot.lane.b32.xlu0 %v2006_v2, %s1956_s21 }
  0x29   : > { %513 = vrot.lane.b32.xlu1 %v181_v4, %s1953_s19 }
  0x2b   : > { %853 = vrot.lane.b32.xlu0 %v2001_v1, %s1956_s21 }
  0x2d   : > { %1030 = vrot.lane.b32.xlu1 %v175_v3, %s1957_s22 }
  0x2f   : > { %1028 = vrot.lane.b32.xlu0 %v2006_v2, %s1957_s22 }
  0x31   : > { %686 = vrot.lane.b32.xlu1 %v181_v4, %s1955_s20 }
  0x33   : > { %1026 = vrot.lane.b32.xlu0 %v2001_v1, %s1957_s22 }
  0x35   : > { %1201 = vrot.lane.b32.xlu1 %v2006_v2, %s1958_s23 }
  0x37   : > { %859 = vrot.lane.b32.xlu0 %v181_v4, %s1956_s21  ;;  %s1920_s21 = smul.u32 24, %s2169_s13 }
  0x39   : > { %1199 = vrot.lane.b32.xlu1 %v2001_v1, %s1958_s23 }
  0x3b   : > { %1203 = vrot.lane.b32.xlu0 %v175_v3, %s1958_s23 }
  0x3d   : > { %1205 = vrot.lane.b32.xlu1 %v181_v4, %s1958_s23 }
  0x3f   : > { %1032 = vrot.lane.b32.xlu0 %v181_v4, %s1957_s22 }
  0x41   : > { %1376 = vrot.lane.b32.xlu1 %v175_v3, %s1959_s24 }
  0x43   : > { %1374 = vrot.lane.b32.xlu0 %v2006_v2, %s1959_s24 }
  0x45   : > { %1378 = vrot.lane.b32.xlu1 %v181_v4, %s1959_s24 }
  0x47   : > { %1372 = vrot.lane.b32.xlu0 %v2001_v1, %s1959_s24  ;;  %s170_s24 = scalar_lea.vmem %s2167_s3, %s1920_s21 }
  0x49   : > { %1549 = vrot.lane.b32.xlu1 %v175_v3, %s1960_s25 }
  0x4b   : > { %1547 = vrot.lane.b32.xlu0 %v2006_v2, %s1960_s25 }
  0x4d   : > { %1545 = vrot.lane.b32.xlu1 %v2001_v1, %s1960_s25 }
  0x4f   : > { %1551 = vrot.lane.b32.xlu0 %v181_v4, %s1960_s25 }
  0x53   : > { %1713 = vperm.xlu0 %1940, %v1710_v6  }
  0x83   : > { %v183_v7 = vpop.permute.xlu1 %182 }
  0x85   : > { %v185_v8 = vpop.permute.xlu0 %184 }
  0x86   : > { %v191_v14 = vsel %vm190_vm1, %v183_v7, %v185_v8  ;;  %v1832_v7 = vld [vmem:[%s2165_s1 + $0x40] sm:$0xff] }
  0x87   : > { %v508_v9 = vpop.permute.xlu1 %507 }
  0x89   : > { %v187_v10 = vpop.permute.xlu0 %186 }
  0x8a   : > { %v192_v11 = vsel %vm190_vm1, %v185_v8, %v187_v10 }
  0x8b   : > { %v510_v13 = vpop.permute.xlu1 %509  ;;  %1786 = vmatprep.subr.msk.mxu0 %vm198_vm2, %v192_v11 }
  0x8c   : > { %1787 = vmatpush1.msk.msra.mxu0 %vm198_vm2, %v191_v14  ;;  %v516_v20 = vsel %vm515_vm4, %v508_v9, %v510_v13 }
  0x8d   : > { %1788 = vmatmul.mubr.msk.f32.vlgmr.msra.gmra.mrb[0].mxu0 %vm194_vm3, %v1785_v12  ;;  %v512_v15 = vpop.permute.xlu0 %511  ;;  %1791 = vmatprep.subr.msk.mxu0 %vm198_vm2, %v2006_v2 }
  0x8e   : > { %v517_v16 = vsel %vm515_vm4, %v510_v13, %v512_v15  ;;  %1792 = vmatpush1.msk.msra.mxu0 %vm198_vm2, %v2001_v1  ;;  %422 = vmatprep.mubr.f32.mxu0 %v1951_v0 }
  0x8f   : > { %v685_v17 = vpop.permute.xlu1 %684  ;;  %1797 = vmatprep.subr.msk.mxu0 %vm198_vm2, %v517_v16 }
  0x91   : > { %v683_v18 = vpop.permute.xlu0 %682 }
  0x92   : > { %v690_v22 = vsel %vm688_vm5, %v683_v18, %v685_v17 }
  0x93   : > { %v189_v21 = vpop.permute.xlu1 %188 }
  0x94   : > { %v193_v23 = vsel %vm190_vm1, %v187_v10, %v189_v21 }
  0x95   : > { %1860 = vmatpush3.msk.msra.mxu1 %vm198_vm2, %v193_v23  ;;  %v681_v24 = vpop.permute.xlu0 %680  ;;  %1793 = vmatmul.mubr.msk.f32.vlgmr.msra.gmra.mrb[0].mxu0 %vm194_vm3, %v173_v19 }
  0x96   : > { %1798 = vmatpush1.msk.msra.mxu0 %vm198_vm2, %v516_v20  ;;  %1862 = vmatmul.mubr.msk.f32.vlgmr.msra.gmra.mrb[0].mxu1 %vm194_vm3, %v1785_v12  ;;  %v689_v32 = vsel %vm688_vm5, %v681_v24, %v683_v18 }
  0x97   : > { %1803 = vmatprep.subr.msk.mxu0 %vm198_vm2, %v690_v22  ;;  %v858_v26 = vpop.permute.xlu1 %857  ;;  %1864 = vmatprep.subr.mxu1 %v1951_v0 }
  0x98   : > { %1865 = vmatpush3.msk.msra.mxu1 %vm198_vm2, %v172_v25  ;;  %1866 = vmatprep.mubr.msk.f32.mxu1 %vm1954_vm0, %v1951_v0 }
  0x99   : > { %v856_v27 = vpop.permute.xlu0 %855  ;;  %592 = vmatprep.mubr.f32.mxu0 %v1951_v0  ;;  %1869 = vmatprep.subr.mxu1 %v1951_v0 }
  0x9a   : > { %1867 = vmatmul.mubr.msk.f32.vlgmr.msra.gmra.mrb[2].mxu1 %vm194_vm3, %v173_v19  ;;  %v863_v30 = vsel %vm861_vm6, %v856_v27, %v858_v26 }
  0x9b   : > { %v514_v29 = vpop.permute.xlu1 %513  ;;  %1871 = vmatprep.mubr.msk.f32.mxu1 %vm1954_vm0, %v1951_v0 }
  0x9c   : > { %v518_v31 = vsel %vm515_vm4, %v512_v15, %v514_v29 }
  0x9d   : > { %v854_v33 = vpop.permute.xlu0 %853  ;;  %1799 = vmatmul.mubr.msk.f32.vlgmr.msra.gmra.mrb[0].mxu0 %vm194_vm3, %v1796_v28  ;;  %1870 = vmatpush3.msk.msra.mxu1 %vm198_vm2, %v518_v31 }
  0x9e   : > { %1804 = vmatpush1.msk.msra.mxu0 %vm198_vm2, %v689_v32  ;;  %765 = vmatprep.mubr.f32.mxu0 %v1951_v0  ;;  %v862_v40 = vsel %vm861_vm6, %v854_v33, %v856_v27 }
  0x9f   : > { %1809 = vmatprep.subr.msk.mxu0 %vm198_vm2, %v863_v30  ;;  %v1031_v34 = vpop.permute.xlu1 %1030  ;;  %1874 = vmatprep.subr.mxu1 %v1951_v0 }
  0xa0   : > { %1872 = vmatmul.mubr.msk.f32.vlgmr.msra.gmra.mrb[4].mxu1 %vm194_vm3, %v1796_v28 }
  0xa1   : > { %v1029_v35 = vpop.permute.xlu0 %1028  ;;  %1876 = vmatprep.mubr.msk.f32.mxu1 %vm1954_vm0, %v1951_v0 }
  0xa2   : > { %v1036_v38 = vsel %vm1034_vm7, %v1029_v35, %v1031_v34 }
  0xa3   : > { %v687_v37 = vpop.permute.xlu1 %686 }
  0xa4   : > { %v691_v39 = vsel %vm688_vm5, %v685_v17, %v687_v37 }
  0xa5   : > { %v1027_v41 = vpop.permute.xlu0 %1026  ;;  %1805 = vmatmul.mubr.msk.f32.vlgmr.msra.gmra.mrb[0].mxu0 %vm194_vm3, %v1802_v36  ;;  %1875 = vmatpush3.msk.msra.mxu1 %vm198_vm2, %v691_v39 }
  0xa6   : > { %1810 = vmatpush1.msk.msra.mxu0 %vm198_vm2, %v862_v40  ;;  %1879 = vmatprep.subr.mxu1 %v1951_v0  ;;  %v1035_v47 = vsel %vm1034_vm7, %v1027_v41, %v1029_v35 }
  0xa7   : > { %1815 = vmatprep.subr.msk.mxu0 %vm198_vm2, %v1036_v38  ;;  %v1202_v42 = vpop.permute.xlu1 %1201  ;;  %1877 = vmatmul.mubr.msk.f32.vlgmr.msra.gmra.mrb[6].mxu1 %vm194_vm3, %v1802_v36 }
  0xa8   : > { %938 = vmatprep.mubr.f32.mxu0 %v1951_v0  ;;  %1881 = vmatprep.mubr.msk.f32.mxu1 %vm1954_vm0, %v1951_v0 }
  0xa9   : > { %v860_v43 = vpop.permute.xlu0 %859 }
  0xaa   : > { %v864_v44 = vsel %vm861_vm6, %v858_v26, %v860_v43 }
  0xab   : > { %1880 = vmatpush3.msk.msra.mxu1 %vm198_vm2, %v864_v44  ;;  %v1200_v46 = vpop.permute.xlu1 %1199 }
  0xac   : > { %1882 = vmatmul.mubr.msk.f32.vlgmr.msra.gmra.mrb[8].mxu1 %vm194_vm3, %v1808_v45  ;;  %1884 = vmatprep.subr.mxu1 %v1951_v0  ;;  %v1208_v55 = vsel %vm1207_vm8, %v1200_v46, %v1202_v42 }
  0xad   : > { %v1204_v48 = vpop.permute.xlu0 %1203  ;;  %1811 = vmatmul.mubr.msk.f32.vlgmr.msra.gmra.mrb[0].mxu0 %vm194_vm3, %v1808_v45  ;;  %1886 = vmatprep.mubr.msk.f32.mxu1 %vm1954_vm0, %v1951_v0 }
  0xae   : > { %v1209_v49 = vsel %vm1207_vm8, %v1202_v42, %v1204_v48  ;;  %1816 = vmatpush1.msk.msra.mxu0 %vm198_vm2, %v1035_v47  ;;  %1111 = vmatprep.mubr.f32.mxu0 %v1951_v0 }
  0xaf   : > { %1821 = vmatprep.subr.msk.mxu0 %vm198_vm2, %v1209_v49  ;;  %v1206_v50 = vpop.permute.xlu1 %1205 }
  0xb0   : > { %v1210_v53 = vsel %vm1207_vm8, %v1204_v48, %v1206_v50 }
  0xb1   : > { %v1033_v51 = vpop.permute.xlu0 %1032 }
  0xb2   : > { %v1037_v54 = vsel %vm1034_vm7, %v1031_v34, %v1033_v51 }
  0xb3   : > { %1885 = vmatpush3.msk.msra.mxu1 %vm198_vm2, %v1037_v54  ;;  %v1377_v56 = vpop.permute.xlu1 %1376 }
  0xb4   : > { %1887 = vmatmul.mubr.msk.f32.vlgmr.msra.gmra.mrb[10].mxu1 %vm194_vm3, %v1814_v52  ;;  %1889 = vmatprep.subr.mxu1 %v1951_v0 }
  0xb5   : > { %v1375_v57 = vpop.permute.xlu0 %1374  ;;  %1817 = vmatmul.mubr.msk.f32.vlgmr.msra.gmra.mrb[0].mxu0 %vm194_vm3, %v1814_v52  ;;  %1890 = vmatpush3.msk.msra.mxu1 %vm198_vm2, %v1210_v53 }
  0xb6   : > { %v1382_v59 = vsel %vm1380_vm9, %v1375_v57, %v1377_v56  ;;  %1822 = vmatpush1.msk.msra.mxu0 %vm198_vm2, %v1208_v55  ;;  %1891 = vmatprep.mubr.msk.f32.mxu1 %vm1954_vm0, %v1951_v0 }
  0xb7   : > { %v1379_v60 = vpop.permute.xlu1 %1378  ;;  %1894 = vmatprep.subr.mxu1 %v1951_v0  ;;  %1827 = vmatprep.subr.msk.mxu0 %vm198_vm2, %v1382_v59 }
  0xb8   : > { %v1383_v61 = vsel %vm1380_vm9, %v1377_v56, %v1379_v60  ;;  %1892 = vmatmul.mubr.msk.f32.vlgmr.msra.gmra.mrb[12].mxu1 %vm194_vm3, %v1820_v58  ;;  %1284 = vmatprep.mubr.f32.mxu0 %v1951_v0 }
  0xb9   : > { %v1373_v62 = vpop.permute.xlu0 %1372  ;;  %1895 = vmatpush3.msk.msra.mxu1 %vm198_vm2, %v1383_v61  ;;  %1896 = vmatprep.mubr.msk.f32.mxu1 %vm1954_vm0, %v1951_v0 }
  0xba   : > { %1899 = vmatprep.subr.mxu1 %v1951_v0  ;;  %v1381_v1 = vsel %vm1380_vm9, %v1373_v62, %v1375_v57 }
  0xbb   : > { %v1550_v2 = vpop.permute.xlu1 %1549 }
  0xbc   : > { %1897 = vmatmul.mubr.msk.f32.vlgmr.msra.gmra.mrb[14].mxu1 %vm194_vm3, %v1826_v63 }
  0xbd   : > { %v1548_v3 = vpop.permute.xlu0 %1547  ;;  %1823 = vmatmul.mubr.msk.f32.vlgmr.msra.gmra.mrb[0].mxu0 %vm194_vm3, %v1820_v58  ;;  %1901 = vmatprep.mubr.msk.f32.mxu1 %vm1954_vm0, %v1951_v0 }
  0xbe   : > { %1828 = vmatpush1.msk.msra.mxu0 %vm198_vm2, %v1381_v1  ;;  %v1555_v4 = vsel %vm1553_vm10, %v1548_v3, %v1550_v2  ;;  %1457 = vmatprep.mubr.f32.mxu0 %v1951_v0 }
  0xbf   : > { %1833 = vmatprep.subr.msk.mxu0 %vm198_vm2, %v1555_v4  ;;  %v1546_v5 = vpop.permute.xlu1 %1545 }
  0xc0   : > { %v1554_v9 = vsel %vm1553_vm10, %v1546_v5, %v1548_v3 }
  0xc1   : > { %v1552_v6 = vpop.permute.xlu0 %1551 }
  0xc2   : > { %v1556_v8 = vsel %vm1553_vm10, %v1550_v2, %v1552_v6 }
  0xc3   : > { %1900 = vmatpush3.msk.msra.mxu1 %vm198_vm2, %v1556_v8 }
  0xc4   : > { %1902 = vmatmul.mubr.msk.f32.vlgmr.msra.gmra.mrb[16].mxu1 %vm194_vm3, %v1832_v7 }
  0xc5   : > { %1829 = vmatmul.mubr.msk.f32.vlgmr.msra.gmra.mrb[0].mxu0 %vm194_vm3, %v1826_v63 }
  0xc6   : > { %1834 = vmatpush1.msk.msra.mxu0 %vm198_vm2, %v1554_v9  ;;  %1630 = vmatprep.mubr.f32.mxu0 %v1951_v0 }
  0xcd   : > { %1835 = vmatmul.mubr.msk.f32.vlgmr.msra.gmra.mrb[0].mxu0 %vm194_vm3, %v1832_v7 }
  0xd2   : > { %v1714_v33 = vpop.permute.xlu0 %1713 }
 0x169   : > { %v342_v10 = vpop.f32.mrb[0].mxu1 }
 0x16a   : > { %v1863_v11 = vpop.f32.mrb[1].mxu1 }
 0x16d   : > { %v495_v12 = vpop.f32.mrb[2].mxu1 }
 0x16e   : > { %v496_v13 = vadd.f32 %v495_v12, %v342_v10  ;;  %v1868_v14 = vpop.f32.mrb[3].mxu1 }
 0x173   : > { %v665_v15 = vpop.f32.mrb[4].mxu1 }
 0x174   : > { %v671_v16 = vadd.f32 %v665_v15, %v496_v13  ;;  %v1873_v17 = vpop.f32.mrb[5].mxu1 }
 0x17a   : > { %v838_v18 = vpop.f32.mrb[6].mxu1 }
 0x17b   : > { %v844_v19 = vadd.f32 %v838_v18, %v671_v16  ;;  %v1878_v20 = vpop.f32.mrb[7].mxu1 }
 0x17f   : > { %v1011_v21 = vpop.f32.mrb[8].mxu1 }
 0x180   : > { %v1017_v22 = vadd.f32 %v1011_v21, %v844_v19  ;;  %v1883_v23 = vpop.f32.mrb[9].mxu1 }
 0x187   : > { %v1184_v24 = vpop.f32.mrb[10].mxu1 }
 0x188   : > { %v1190_v25 = vadd.f32 %v1184_v24, %v1017_v22  ;;  %v1888_v0 = vpop.f32.mrb[11].mxu1 }
 0x18b   : > { %v1357_v26 = vpop.f32.mrb[12].mxu1 }
 0x18c   : > { %v1363_v27 = vadd.f32 %v1357_v26, %v1190_v25  ;;  %v1893_v28 = vpop.f32.mrb[13].mxu1 }
 0x18f   : > { %v1530_v29 = vpop.f32.mrb[14].mxu1 }
 0x190   : > { %v1536_v30 = vadd.f32 %v1530_v29, %v1363_v27  ;;  %v1898_v31 = vpop.f32.mrb[15].mxu1 }
 0x197   : > { %v1703_v32 = vpop.f32.mrb[16].mxu1 }
 0x198   : > { %v1709_v34 = vadd.f32 %v1703_v32, %v1536_v30  ;;  %v1903_v35 = vpop.f32.mrb[17].mxu1 }
 0x19a   : > { %v1718_v36 = vadd.f32 %v1714_v33, %v1709_v34 }
 0x19c   : > { %1721 = vst [vmem:[%s170_s24 + $0x10] sm:$0xff] %v1718_v36 }
 0x1a0   : > { %v1632_v37 = vpop.f32.mrb[0].mxu0 }
 0x1a1   : > { %v1716_v38 = vadd.f32 %v1714_v33, %v1632_v37  ;;  %v1634_v39 = vpop.f32.mrb[1].mxu0 }
 0x1a2   : > { %v1717_v40 = vadd.f32 %v1714_v33, %v1634_v39 }
 0x1a3   : > { %1719 = vst [vmem:[%s170_s24] sm:$0xff] %v1716_v38 }
 0x1a4   : > { %1720 = vst [vmem:[%s170_s24 + $0x8] sm:$0xff] %v1717_v40 }
 0x1a5 PF: > { %s13_s12 = sadd.s32 1, %s1949_s12  }
 0x1a6   : > { %p10_p4 = scmp.ge.s32.totalorder %s13_s12, 4  }
 0x1a8   :  { %12 = sbr.rel (!%p10_p4) target bundleno = 1 (0x1), region = 70 }

</bundles_post_ra>
